<compile_context>
chip_gen: v7x
topology: tpu7x:2x2x1
jax: 0.10.0
libtpu: 0.0.40
codegen_flags: <defaults>
</compile_context>

<pallas_src>
import functools

import jax
import jax.numpy as jnp
from jax import lax
from jax.experimental import pallas as pl
from jax.experimental.pallas import tpu as pltpu

# Row tile of 512 targets the v6e sweet spot (~85% of HBM roofline); tiles are
# clamped to the problem size, lane tiles stay multiples of 128 (or full-N).
TM_DEFAULT = 512
TN_DEFAULT = 512
TK_DEFAULT = 512
# Safely below v7x's 64 MiB physical VMEM, above the 16/32 MiB default scoped limits.
VMEM_LIMIT_BYTES = 48 * 1024 * 1024


# ---------------------------------------------------------------------------
# Pallas kernels
# ---------------------------------------------------------------------------
def _matmul_bias_kernel(x_ref, w_ref, b_ref, o_ref, acc_ref, *, relu):
    """(TM, TK) @ (TK, TN) with K-reduction grid axis, f32 accumulator, fused bias(+ReLU)."""
    @pl.when(pl.program_id(2) == 0)
    def _():
        acc_ref[...] = jnp.zeros_like(acc_ref)

    acc_ref[...] += jnp.dot(x_ref[...], w_ref[...],
                            preferred_element_type=jnp.float32)

    @pl.when(pl.program_id(2) == pl.num_programs(2) - 1)
    def _():
        y = acc_ref[...] + b_ref[...]
        if relu:
            y = jnp.maximum(y, 0.0)
        o_ref[...] = y.astype(o_ref.dtype)


def _conv3x3_kernel(*refs, n_phase, tap_plan, Ho, Wo):
    """Direct 3x3 conv for one image: accumulate the 9 taps from phase views in VMEM."""
    phase_refs = refs[:n_phase]
    w_ref, b_ref, o_ref = refs[n_phase:]
    C = w_ref.shape[1]
    Co = w_ref.shape[2]
    acc = jnp.zeros((Ho * Wo, Co), jnp.float32)
    for t, (p, qh, qw) in enumerate(tap_plan):       # static, fully unrolled
        v = phase_refs[p][0, qh:qh + Ho, qw:qw + Wo, :]        # (Ho, Wo, C), static slice
        acc = acc + jnp.dot(v.reshape(Ho * Wo, C), w_ref[t],
                            preferred_element_type=jnp.float32)
    y = jnp.maximum(acc + b_ref[...], 0.0)
    o_ref[0] = y.astype(o_ref.dtype)


def _fused_residual_kernel(a_ref, wa_ref, ba_ref, r_ref, wr_ref, br_ref, o_ref):
    """relu( (a@wa + ba) + (r@wr + br) ) — cb_3 + cb_residual + add + ReLU fused."""
    ya = jnp.dot(a_ref[...], wa_ref[...],
                 preferred_element_type=jnp.float32) + ba_ref[...]
    yr = jnp.dot(r_ref[...], wr_ref[...],
                 preferred_element_type=jnp.float32) + br_ref[...]
    o_ref[...] = jnp.maximum(ya + yr, 0.0).astype(o_ref.dtype)


# ---------------------------------------------------------------------------
# pallas_call wrappers
# ---------------------------------------------------------------------------
def _pick_tiles(M, N, K):
    tm = min(TM_DEFAULT, M)
    tn = min(TN_DEFAULT, N)
    # Reduction tile must divide K exactly (ragged K would feed garbage into the acc).
    if K <= TK_DEFAULT:
        tk = K
    elif K % TK_DEFAULT == 0:
        tk = TK_DEFAULT
    else:
        tk = K
    return tm, tn, tk


def matmul_bias(x, w, bias, *, relu, out_dtype):
    """out = [relu](x @ w + bias), M/N/K tiled, no host-side padding or slicing."""
    M, K = x.shape
    _, N = w.shape
    tm, tn, tk = _pick_tiles(M, N, K)
    grid = (pl.cdiv(M, tm), pl.cdiv(N, tn), K // tk)
    cost = pl.CostEstimate(
        flops=2 * M * N * K, transcendentals=0,
        bytes_accessed=(x.size * x.dtype.itemsize + w.size * w.dtype.itemsize +
                        N * 4 + M * N * jnp.dtype(out_dtype).itemsize))
    return pl.pallas_call(
        functools.partial(_matmul_bias_kernel, relu=relu),
        out_shape=jax.ShapeDtypeStruct((M, N), out_dtype),
        grid_spec=pltpu.PrefetchScalarGridSpec(
            num_scalar_prefetch=0,
            grid=grid,
            in_specs=[
                pl.BlockSpec((tm, tk), lambda m, n, k: (m, k)),
                pl.BlockSpec((tk, tn), lambda m, n, k: (k, n)),
                pl.BlockSpec((1, tn), lambda m, n, k: (0, n)),
            ],
            out_specs=pl.BlockSpec((tm, tn), lambda m, n, k: (m, n)),
            scratch_shapes=[pltpu.VMEM((tm, tn), jnp.float32)],
        ),
        compiler_params=pltpu.CompilerParams(
            dimension_semantics=("parallel", "parallel", "arbitrary"),
            vmem_limit_bytes=VMEM_LIMIT_BYTES),
        cost_estimate=cost,
    )(x, w, bias.reshape(1, N).astype(jnp.float32))


def conv3x3_bias_relu(y, w9, bias, *, stride, dilation, out_dtype):
    """3x3 conv (stride, dilation, padding=dilation) + bias + ReLU, no im2col.

    The padded input is split into s*s stride-phase views (total bytes == one
    copy of the padded input); inside the kernel each of the 9 taps is a static
    contiguous window of one phase, matmul'ed and accumulated in f32.
    """
    N, H, W, C = y.shape
    s, d = stride, dilation
    Ho = (H - 1) // s + 1
    Wo = (W - 1) // s + 1
    Co = w9.shape[-1]
    Hp, Wp = H + 2 * d, W + 2 * d
    Hq, Wq = -(-Hp // s), -(-Wp // s)           # ceil-div, phases get identical shapes
    yp = jnp.pad(y, ((0, 0), (d, Hq * s - H - d), (d, Wq * s - W - d), (0, 0)))
    phases = [yp[:, rh::s, rw::s, :] for rh in range(s) for rw in range(s)]
    n_phase = len(phases)

    tap_plan = []
    for t in range(9):
        kh, kw = divmod(t, 3)
        oh, ow = kh * d, kw * d
        tap_plan.append(((oh % s) * s + (ow % s), oh // s, ow // s))

    in_specs = [pl.BlockSpec((1, Hq, Wq, C), lambda n: (n, 0, 0, 0))
                for _ in range(n_phase)]
    in_specs += [pl.BlockSpec((9, C, Co), lambda n: (0, 0, 0)),
                 pl.BlockSpec((1, Co), lambda n: (0, 0))]

    cost = pl.CostEstimate(
        flops=2 * N * Ho * Wo * 9 * C * Co, transcendentals=0,
        bytes_accessed=(yp.size * yp.dtype.itemsize + w9.size * w9.dtype.itemsize +
                        Co * 4 + N * Ho * Wo * Co * jnp.dtype(out_dtype).itemsize))
    out = pl.pallas_call(
        functools.partial(_conv3x3_kernel, n_phase=n_phase,
                          tap_plan=tuple(tap_plan), Ho=Ho, Wo=Wo),
        out_shape=jax.ShapeDtypeStruct((N, Ho * Wo, Co), out_dtype),
        grid_spec=pltpu.PrefetchScalarGridSpec(
            num_scalar_prefetch=0,
            grid=(N,),
            in_specs=in_specs,
            out_specs=pl.BlockSpec((1, Ho * Wo, Co), lambda n: (n, 0, 0)),
        ),
        compiler_params=pltpu.CompilerParams(
            dimension_semantics=("parallel",),
            vmem_limit_bytes=VMEM_LIMIT_BYTES),
        cost_estimate=cost,
    )(*phases, w9, bias.reshape(1, Co).astype(jnp.float32))
    return out, Ho, Wo


def fused_conv_residual(a, wa, ba, r, wr, br, *, out_dtype):
    """relu( (a@wa + ba) + (r@wr + br) ): cb_3 + cb_residual + add + ReLU in one kernel."""
    M, K1 = a.shape
    _, K2 = r.shape
    _, N = wa.shape
    tm = min(TM_DEFAULT, M)
    tn = min(TN_DEFAULT, N)
    grid = (pl.cdiv(M, tm), pl.cdiv(N, tn))
    cost = pl.CostEstimate(
        flops=2 * M * N * (K1 + K2), transcendentals=0,
        bytes_accessed=(a.size * a.dtype.itemsize + r.size * r.dtype.itemsize +
                        wa.size * wa.dtype.itemsize + wr.size * wr.dtype.itemsize +
                        2 * N * 4 + M * N * jnp.dtype(out_dtype).itemsize))
    return pl.pallas_call(
        _fused_residual_kernel,
        out_shape=jax.ShapeDtypeStruct((M, N), out_dtype),
        grid_spec=pltpu.PrefetchScalarGridSpec(
            num_scalar_prefetch=0,
            grid=grid,
            in_specs=[
                pl.BlockSpec((tm, K1), lambda m, n: (m, 0)),
                pl.BlockSpec((K1, tn), lambda m, n: (0, n)),
                pl.BlockSpec((1, tn), lambda m, n: (0, n)),
                pl.BlockSpec((tm, K2), lambda m, n: (m, 0)),
                pl.BlockSpec((K2, tn), lambda m, n: (0, n)),
                pl.BlockSpec((1, tn), lambda m, n: (0, n)),
            ],
            out_specs=pl.BlockSpec((tm, tn), lambda m, n: (m, n)),
        ),
        compiler_params=pltpu.CompilerParams(
            dimension_semantics=("parallel", "parallel"),
            vmem_limit_bytes=VMEM_LIMIT_BYTES),
        cost_estimate=cost,
    )(a, wa, ba.reshape(1, N).astype(jnp.float32),
      r, wr, br.reshape(1, N).astype(jnp.float32))


# ---------------------------------------------------------------------------
# BN folding / parameter initialization
# ---------------------------------------------------------------------------
def bn_fold(gamma, beta, mean, var, eps=1e-5):
    scale = gamma / jnp.sqrt(var + eps)
    bias = beta - mean * scale
    return scale, bias


def init_params(key, in_ch, mid_ch, out_ch):
    keys = jax.random.split(key, 20)

    def conv_w(k, o, i, kh, kw):
        return 0.1 * jax.random.normal(k, (o, i, kh, kw), jnp.float32)  # OIHW

    def bn(k, c):
        k1, k2, k3, k4 = jax.random.split(k, 4)
        gamma = 1.0 + 0.1 * jax.random.normal(k1, (c,), jnp.float32)
        beta = 0.1 * jax.random.normal(k2, (c,), jnp.float32)
        mean = 0.1 * jax.random.normal(k3, (c,), jnp.float32)
        var = jnp.abs(jax.random.normal(k4, (c,), jnp.float32)) + 0.5
        return gamma, beta, mean, var

    return {
        "w1": conv_w(keys[0], mid_ch, in_ch, 1, 1),
        "bn1": bn(keys[1], mid_ch),
        "w2": conv_w(keys[2], mid_ch, mid_ch, 3, 3),
        "bn2": bn(keys[3], mid_ch),
        "w3": conv_w(keys[4], out_ch, mid_ch, 1, 1),
        "bn3": bn(keys[5], out_ch),
        "wr": conv_w(keys[6], out_ch, in_ch, 1, 1),
        "bnr": bn(keys[7], out_ch),
    }


# ---------------------------------------------------------------------------
# bottleNeckPSP forward (Pallas)
# ---------------------------------------------------------------------------
def bottleneck_psp_forward(x_nchw, params, stride, dilation,
                           compute_dtype=jnp.bfloat16):
    N, Cin, H, W = x_nchw.shape
    x = jnp.transpose(x_nchw, (0, 2, 3, 1)).astype(compute_dtype)   # NCHW -> NHWC

    # --- cbr_1: 1x1 conv + BN + ReLU (BN scale folded into weight columns) --
    s1, b1 = bn_fold(*params["bn1"])
    w1 = (jnp.transpose(params["w1"][:, :, 0, 0], (1, 0)) *
          s1[None, :]).astype(compute_dtype)                        # (Cin, Cmid)
    Cmid = w1.shape[1]
    y1 = matmul_bias(x.reshape(-1, Cin), w1, b1, relu=True, out_dtype=compute_dtype)
    y1 = y1.reshape(N, H, W, Cmid)

    # --- cbr_2: direct 3x3 conv (stride, dilation, pad=dilation) + BN + ReLU -
    s2, b2 = bn_fold(*params["bn2"])
    w2 = jnp.transpose(params["w2"], (2, 3, 1, 0)).reshape(9, Cmid, Cmid)
    w2 = (w2 * s2[None, None, :]).astype(compute_dtype)             # (9, Cmid, Cmid)
    y2, Ho, Wo = conv3x3_bias_relu(y1, w2, b2, stride=stride, dilation=dilation,
                                   out_dtype=compute_dtype)         # (N, Ho*Wo, Cmid)

    # --- cb_3 + cb_residual + add + ReLU (single fused kernel) ---------------
    s3, b3 = bn_fold(*params["bn3"])
    w3 = (jnp.transpose(params["w3"][:, :, 0, 0], (1, 0)) * s3[None, :]).astype(compute_dtype)
    sr, br = bn_fold(*params["bnr"])
    wr = (jnp.transpose(params["wr"][:, :, 0, 0], (1, 0)) * sr[None, :]).astype(compute_dtype)
    Cout = w3.shape[1]

    # Residual path: 1x1 stride-s conv. For stride=1 this is a free reshape; for
    # stride>1 it is one output-sized slice of the already-NHWC input.
    # TODO(synk): fold the stride-s spatial gather into the fused kernel's index_map.
    xr = x[:, ::stride, ::stride, :] if stride > 1 else x
    out = fused_conv_residual(y2.reshape(-1, Cmid), w3, b3,
                              xr.reshape(-1, Cin), wr, br,
                              out_dtype=jnp.float32)
    out = out.reshape(N, Ho, Wo, Cout)
    return jnp.transpose(out, (0, 3, 1, 2))                         # NHWC -> NCHW


# ---------------------------------------------------------------------------
# Pure-JAX reference (correctness check only)
# ---------------------------------------------------------------------------
def reference_forward(x, params, stride, dilation):
    def conv(x, w, s, d, pad):
        return lax.conv_general_dilated(
            x, w, window_strides=(s, s), padding=[(pad, pad), (pad, pad)],
            rhs_dilation=(d, d),
            dimension_numbers=("NCHW", "OIHW", "NCHW"))

    def bn(x, g, b, m, v, eps=1e-5):
        sc = g / jnp.sqrt(v + eps)
        return x * sc[None, :, None, None] + (b - m * sc)[None, :, None, None]

    y = jax.nn.relu(bn(conv(x, params["w1"], 1, 1, 0), *params["bn1"]))
    y = jax.nn.relu(bn(conv(y, params["w2"], stride, dilation, dilation),
                       *params["bn2"]))
    y = bn(conv(y, params["w3"], 1, 1, 0), *params["bn3"])
    r = bn(conv(x, params["wr"], stride, 1, 0), *params["bnr"])
    return jax.nn.relu(y + r)


# ---------------------------------------------------------------------------
if __name__ == "__main__":
    in_ch, mid_ch, out_ch = 4, 4, 8
    stride, dilation = 2, 2
    N, H, W = 2, 16, 16

    key = jax.random.PRNGKey(0)
    kx, kp, kx2 = jax.random.split(key, 3)
    x = jax.random.normal(kx, (N, in_ch, H, W), jnp.float32)
    params = init_params(kp, in_ch, mid_ch, out_ch)

    ref = jax.block_until_ready(reference_forward(x, params, stride, dilation))

    # Strict numerical check with f32 matmul operands.
    out_f32 = jax.block_until_ready(
        bottleneck_psp_forward(x, params, stride, dilation, compute_dtype=jnp.float32))
    assert out_f32.shape == ref.shape, (out_f32.shape, ref.shape)
    assert jnp.allclose(out_f32, ref, atol=1e-3, rtol=1e-3), \
        float(jnp.max(jnp.abs(out_f32 - ref)))

    # Default performance path: bf16 operands, f32 accumulation/epilogue.
    out_bf16 = jax.block_until_ready(
        bottleneck_psp_forward(x, params, stride, dilation, compute_dtype=jnp.bfloat16))
    assert out_bf16.shape == ref.shape
    assert jnp.allclose(out_bf16, ref, atol=1e-1, rtol=1e-1), \
        float(jnp.max(jnp.abs(out_bf16 - ref)))

    # Also exercise the stride=1 (single-phase) conv specialization, common in PSPNet.
    x2 = jax.random.normal(kx2, (1, in_ch, 8, 8), jnp.float32)
    ref2 = jax.block_until_ready(reference_forward(x2, params, 1, 2))
    out2 = jax.block_until_ready(
        bottleneck_psp_forward(x2, params, 1, 2, compute_dtype=jnp.float32))
    assert out2.shape == ref2.shape
    assert jnp.allclose(out2, ref2, atol=1e-3, rtol=1e-3), \
        float(jnp.max(jnp.abs(out2 - ref2)))

    print("KERNEL_OK")
</pallas_src>

<mosaic_0001>
module attributes {stable_mosaic.version = 11 : i64} {
  func.func @_matmul_bias_kernel(%arg0: i32, %arg1: i32, %arg2: i32, %arg3: memref<512x4xf32, #tpu.memory_space<vmem>>, %arg4: memref<4x4xf32, #tpu.memory_space<vmem>>, %arg5: memref<1x4xf32, #tpu.memory_space<vmem>>, %arg6: memref<512x4xf32, #tpu.memory_space<vmem>>, %arg7: memref<512x4xf32, #tpu.memory_space<vmem>>) attributes {dimension_semantics = [#tpu.dimension_semantics<parallel>, #tpu.dimension_semantics<parallel>, #tpu.dimension_semantics<arbitrary>], iteration_bounds = array<i64: 1, 1, 1>, scalar_prefetch = 0 : i64, scratch_operands = 1 : i64, tpu.core_type = #tpu.core_type<tc>, window_params = [{transform_indices = @transform_0, window_bounds = array<i64: 512, 4>}, {transform_indices = @transform_1, window_bounds = array<i64: 4, 4>}, {transform_indices = @transform_2, window_bounds = array<i64: 1, 4>}, {transform_indices = @transform_3, window_bounds = array<i64: 512, 4>}]} {
    %c0_i32 = arith.constant 0 : i32
    %0 = arith.cmpi eq, %arg2, %c0_i32 : i32
    %1 = arith.extui %0 : i1 to i32
    %c0_i32_0 = arith.constant 0 : i32
    %2 = arith.cmpi ne, %1, %c0_i32_0 : i32
    scf.if %2 {
      %cst_10 = arith.constant 0.000000e+00 : f32
      %12 = vector.broadcast %cst_10 : f32 to vector<512x4xf32>
      %c0_11 = arith.constant 0 : index
      %c0_12 = arith.constant 0 : index
      %13 = vector.load %arg7[%c0_11, %c0_12] : memref<512x4xf32, #tpu.memory_space<vmem>>, vector<512x4xf32>
      tpu.vector_store %arg7[%c0_11, %c0_12], %12 {strides = array<i32>} : memref<512x4xf32, #tpu.memory_space<vmem>>, vector<512x4xf32>,
    } else {
    }
    %c0 = arith.constant 0 : index
    %c0_1 = arith.constant 0 : index
    %3 = vector.load %arg7[%c0, %c0_1] : memref<512x4xf32, #tpu.memory_space<vmem>>, vector<512x4xf32>
    %c0_2 = arith.constant 0 : index
    %c0_3 = arith.constant 0 : index
    %4 = vector.load %arg3[%c0_2, %c0_3] : memref<512x4xf32, #tpu.memory_space<vmem>>, vector<512x4xf32>
    %c0_4 = arith.constant 0 : index
    %c0_5 = arith.constant 0 : index
    %5 = vector.load %arg4[%c0_4, %c0_5] : memref<4x4xf32, #tpu.memory_space<vmem>>, vector<4x4xf32>
    %cst = arith.constant dense<0.000000e+00> : vector<512x4xf32>
    %6 = tpu.matmul %4, %5, %cst {dimension_numbers = #tpu.dot_dimension_numbers<[1], [0], [0], [1], [0, 0, 1, 1], [], []>} : vector<512x4xf32>, vector<4x4xf32>, vector<512x4xf32> -> vector<512x4xf32>
    %7 = arith.addf %3, %6 : vector<512x4xf32>
    %c0_6 = arith.constant 0 : index
    %c0_7 = arith.constant 0 : index
    %8 = vector.load %arg7[%c0_6, %c0_7] : memref<512x4xf32, #tpu.memory_space<vmem>>, vector<512x4xf32>
    tpu.vector_store %arg7[%c0_6, %c0_7], %7 {strides = array<i32>} : memref<512x4xf32, #tpu.memory_space<vmem>>, vector<512x4xf32>,
    %c0_i32_8 = arith.constant 0 : i32
    %9 = arith.cmpi eq, %arg2, %c0_i32_8 : i32
    %10 = arith.extui %9 : i1 to i32
    %c0_i32_9 = arith.constant 0 : i32
    %11 = arith.cmpi ne, %10, %c0_i32_9 : i32
    scf.if %11 {
      %c0_10 = arith.constant 0 : index
      %c0_11 = arith.constant 0 : index
      %12 = vector.load %arg7[%c0_10, %c0_11] : memref<512x4xf32, #tpu.memory_space<vmem>>, vector<512x4xf32>
      %c0_12 = arith.constant 0 : index
      %c0_13 = arith.constant 0 : index
      %13 = vector.load %arg5[%c0_12, %c0_13] : memref<1x4xf32, #tpu.memory_space<vmem>>, vector<1x4xf32>
      %14 = vector.broadcast %13 : vector<1x4xf32> to vector<512x4xf32>
      %15 = arith.addf %12, %14 : vector<512x4xf32>
      %cst_14 = arith.constant 0.000000e+00 : f32
      %16 = vector.broadcast %cst_14 : f32 to vector<512x4xf32>
      %17 = arith.maximumf %15, %16 : vector<512x4xf32>
      %c0_15 = arith.constant 0 : index
      %c0_16 = arith.constant 0 : index
      %18 = vector.load %arg6[%c0_15, %c0_16] : memref<512x4xf32, #tpu.memory_space<vmem>>, vector<512x4xf32>
      tpu.vector_store %arg6[%c0_15, %c0_16], %17 {strides = array<i32>} : memref<512x4xf32, #tpu.memory_space<vmem>>, vector<512x4xf32>,
    } else {
    }
    return
  }
  func.func @transform_0(%arg0: i32, %arg1: i32, %arg2: i32) -> (i32, i32) {
    %c0_i32 = arith.constant 0 : i32
    return %arg0, %arg2 : i32, i32
  }
  func.func @transform_1(%arg0: i32, %arg1: i32, %arg2: i32) -> (i32, i32) {
    %c0_i32 = arith.constant 0 : i32
    return %arg2, %arg1 : i32, i32
  }
  func.func @transform_2(%arg0: i32, %arg1: i32, %arg2: i32) -> (i32, i32) {
    %c0_i32 = arith.constant 0 : i32
    %c0_i32_0 = arith.constant 0 : i32
    return %c0_i32, %arg1 : i32, i32
  }
  func.func @transform_3(%arg0: i32, %arg1: i32, %arg2: i32) -> (i32, i32) {
    %c0_i32 = arith.constant 0 : i32
    return %arg0, %arg1 : i32, i32
  }
}

</mosaic_0001>

<bundles_post_ra>
// kernel: tpu_custom_call.1
= control target key start
LH: loop header
LB: loop body
LE: loop exit
PB: predicated region body
PF: predicated region fallthrough
CT: control target
= control target key end

     0   :  { %vm405_vm0 = vcmask 1043456   ;;  %vm18_vm1 = vcmask 31744   ;;  %v1424_v3 = vmov 0.0   ;;  %s2237_s1 = inlined_call_operand.vmem [shape: f32[4,4], index: 1, kind: input, shape index: {}]   ;;  %s2238_s0 = inlined_call_operand.vmem [shape: f32[512,4], index: 0, kind: input, shape index: {}]   ;;  %s2239_s2 = inlined_call_operand.vmem [shape: f32[1,4], index: 2, kind: input, shape index: {}]   ;;  %s2240_s3 = inlined_call_operand.vmem [shape: f32[512,4], index: 3, kind: output, shape index: {}]  }
   0x1   :  { %v1448_v0 = vld [vmem:[%s2237_s1] sm:$0xf]  ;;  %20 = vst.msk [vmem:[#allocation2 + $0x8] sm:$0xff] %vm18_vm1, %v1424_v3  ;;  %19 = vst.msk [vmem:[#allocation2] sm:$0xff] %vm18_vm1, %v1424_v3  ;;  %v148_v4 = vld [vmem:[%s2238_s0 + $0x8] sm:$0xff] }
   0x2   :  { %v1453_v1 = vld [vmem:[%s2238_s0] sm:$0xff]  ;;  %21 = vst.msk [vmem:[#allocation2 + $0x10] sm:$0xff] %vm18_vm1, %v1424_v3  ;;  %22 = vst.msk [vmem:[#allocation2 + $0x18] sm:$0xff] %vm18_vm1, %v1424_v3  ;;  %1323 = vmatprep.subr.msk.mxu0 %vm405_vm0, %v1448_v0  ;;  %1421 = vmatprep.subr.msk.mxu1 %vm405_vm0, %v1448_v0  ;;  %v180_v5 = vld [vmem:[%s2238_s0 + $0x108] sm:$0xff] }
   0x3   :  { %v1458_v2 = vld [vmem:[%s2238_s0 + $0x100] sm:$0xff]  ;;  %23 = vst.msk [vmem:[#allocation2 + $0x20] sm:$0xff] %vm18_vm1, %v1424_v3  ;;  %24 = vst.msk [vmem:[#allocation2 + $0x28] sm:$0xff] %vm18_vm1, %v1424_v3  ;;  %1324 = vmatpush3.msk.msra.mxu0 %vm405_vm0, %v1448_v0  ;;  %1422 = vmatpush3.msk.msra.mxu1 %vm405_vm0, %v1448_v0  ;;  %v149_v6 = vld [vmem:[%s2238_s0 + $0x10] sm:$0xff] }
   0x4   :  { %25 = vst.msk [vmem:[#allocation2 + $0x30] sm:$0xff] %vm18_vm1, %v1424_v3  ;;  %26 = vst.msk [vmem:[#allocation2 + $0x38] sm:$0xff] %vm18_vm1, %v1424_v3  ;;  %v181_v7 = vld [vmem:[%s2238_s0 + $0x110] sm:$0xff]  ;;  %1325 = vmatprep.mubr.msk.f32.mxu0 %vm18_vm1, %v1453_v1  ;;  %1373 = vmatprep.mubr.msk.f32.mxu1 %vm18_vm1, %v1458_v2  ;;  %v150_v8 = vld [vmem:[%s2238_s0 + $0x18] sm:$0xff] }
   0x5   :  { %27 = vst.msk [vmem:[#allocation2 + $0x40] sm:$0xff] %vm18_vm1, %v1424_v3  ;;  %28 = vst.msk [vmem:[#allocation2 + $0x48] sm:$0xff] %vm18_vm1, %v1424_v3  ;;  %1326 = vmatmul.mubr.msk.f32.vlgmr.msra.gmra.mrb[0].mxu0 %vm18_vm1, %v148_v4  ;;  %1374 = vmatmul.mubr.msk.f32.vlgmr.msra.gmra.mrb[0].mxu1 %vm18_vm1, %v180_v5  ;;  %v182_v9 = vld [vmem:[%s2238_s0 + $0x118] sm:$0xff]  ;;  %v151_v10 = vld [vmem:[%s2238_s0 + $0x20] sm:$0xff] }
   0x6   :  { %29 = vst.msk [vmem:[#allocation2 + $0x50] sm:$0xff] %vm18_vm1, %v1424_v3  ;;  %30 = vst.msk [vmem:[#allocation2 + $0x58] sm:$0xff] %vm18_vm1, %v1424_v3  ;;  %1328 = vmatprep.mubr.msk.f32.mxu0 %vm18_vm1, %v149_v6  ;;  %1376 = vmatprep.mubr.msk.f32.mxu1 %vm18_vm1, %v181_v7  ;;  %v183_v11 = vld [vmem:[%s2238_s0 + $0x120] sm:$0xff]  ;;  %v152_v12 = vld [vmem:[%s2238_s0 + $0x28] sm:$0xff] }
   0x7   :  { %31 = vst.msk [vmem:[#allocation2 + $0x60] sm:$0xff] %vm18_vm1, %v1424_v3  ;;  %32 = vst.msk [vmem:[#allocation2 + $0x68] sm:$0xff] %vm18_vm1, %v1424_v3  ;;  %v184_v13 = vld [vmem:[%s2238_s0 + $0x128] sm:$0xff]  ;;  %v153_v14 = vld [vmem:[%s2238_s0 + $0x30] sm:$0xff] }
   0x8   :  { %33 = vst.msk [vmem:[#allocation2 + $0x70] sm:$0xff] %vm18_vm1, %v1424_v3  ;;  %34 = vst.msk [vmem:[#allocation2 + $0x78] sm:$0xff] %vm18_vm1, %v1424_v3  ;;  %v185_v15 = vld [vmem:[%s2238_s0 + $0x130] sm:$0xff]  ;;  %v154_v16 = vld [vmem:[%s2238_s0 + $0x38] sm:$0xff] }
   0x9   :  { %35 = vst.msk [vmem:[#allocation2 + $0x80] sm:$0xff] %vm18_vm1, %v1424_v3  ;;  %36 = vst.msk [vmem:[#allocation2 + $0x88] sm:$0xff] %vm18_vm1, %v1424_v3  ;;  %1329 = vmatmul.mubr.msk.f32.gmra.mrb[2].mxu0 %vm18_vm1, %v150_v8  ;;  %1377 = vmatmul.mubr.msk.f32.gmra.mrb[2].mxu1 %vm18_vm1, %v182_v9  ;;  %v186_v17 = vld [vmem:[%s2238_s0 + $0x138] sm:$0xff]  ;;  %v155_v18 = vld [vmem:[%s2238_s0 + $0x40] sm:$0xff] }
   0xa   :  { %37 = vst.msk [vmem:[#allocation2 + $0x90] sm:$0xff] %vm18_vm1, %v1424_v3  ;;  %38 = vst.msk [vmem:[#allocation2 + $0x98] sm:$0xff] %vm18_vm1, %v1424_v3  ;;  %1331 = vmatprep.mubr.msk.f32.mxu0 %vm18_vm1, %v151_v10  ;;  %1379 = vmatprep.mubr.msk.f32.mxu1 %vm18_vm1, %v183_v11  ;;  %v187_v19 = vld [vmem:[%s2238_s0 + $0x140] sm:$0xff]  ;;  %v156_v20 = vld [vmem:[%s2238_s0 + $0x48] sm:$0xff] }
   0xb   :  { %39 = vst.msk [vmem:[#allocation2 + $0xa0] sm:$0xff] %vm18_vm1, %v1424_v3  ;;  %40 = vst.msk [vmem:[#allocation2 + $0xa8] sm:$0xff] %vm18_vm1, %v1424_v3  ;;  %v188_v21 = vld [vmem:[%s2238_s0 + $0x148] sm:$0xff]  ;;  %v157_v22 = vld [vmem:[%s2238_s0 + $0x50] sm:$0xff] }
   0xc   :  { %41 = vst.msk [vmem:[#allocation2 + $0xb0] sm:$0xff] %vm18_vm1, %v1424_v3  ;;  %42 = vst.msk [vmem:[#allocation2 + $0xb8] sm:$0xff] %vm18_vm1, %v1424_v3  ;;  %v189_v23 = vld [vmem:[%s2238_s0 + $0x150] sm:$0xff]  ;;  %v158_v24 = vld [vmem:[%s2238_s0 + $0x58] sm:$0xff] }
   0xd   :  { %43 = vst.msk [vmem:[#allocation2 + $0xc0] sm:$0xff] %vm18_vm1, %v1424_v3  ;;  %44 = vst.msk [vmem:[#allocation2 + $0xc8] sm:$0xff] %vm18_vm1, %v1424_v3  ;;  %1332 = vmatmul.mubr.msk.f32.gmra.mrb[4].mxu0 %vm18_vm1, %v152_v12  ;;  %1380 = vmatmul.mubr.msk.f32.gmra.mrb[4].mxu1 %vm18_vm1, %v184_v13  ;;  %v190_v25 = vld [vmem:[%s2238_s0 + $0x158] sm:$0xff]  ;;  %v159_v26 = vld [vmem:[%s2238_s0 + $0x60] sm:$0xff] }
   0xe   :  { %45 = vst.msk [vmem:[#allocation2 + $0xd0] sm:$0xff] %vm18_vm1, %v1424_v3  ;;  %46 = vst.msk [vmem:[#allocation2 + $0xd8] sm:$0xff] %vm18_vm1, %v1424_v3  ;;  %1334 = vmatprep.mubr.msk.f32.mxu0 %vm18_vm1, %v153_v14  ;;  %1382 = vmatprep.mubr.msk.f32.mxu1 %vm18_vm1, %v185_v15  ;;  %v191_v27 = vld [vmem:[%s2238_s0 + $0x160] sm:$0xff]  ;;  %v160_v28 = vld [vmem:[%s2238_s0 + $0x68] sm:$0xff] }
   0xf   :  { %47 = vst.msk [vmem:[#allocation2 + $0xe0] sm:$0xff] %vm18_vm1, %v1424_v3  ;;  %48 = vst.msk [vmem:[#allocation2 + $0xe8] sm:$0xff] %vm18_vm1, %v1424_v3  ;;  %v192_v29 = vld [vmem:[%s2238_s0 + $0x168] sm:$0xff]  ;;  %v161_v30 = vld [vmem:[%s2238_s0 + $0x70] sm:$0xff] }
  0x10   :  { %49 = vst.msk [vmem:[#allocation2 + $0xf0] sm:$0xff] %vm18_vm1, %v1424_v3  ;;  %50 = vst.msk [vmem:[#allocation2 + $0xf8] sm:$0xff] %vm18_vm1, %v1424_v3  ;;  %v193_v31 = vld [vmem:[%s2238_s0 + $0x170] sm:$0xff]  ;;  %v162_v32 = vld [vmem:[%s2238_s0 + $0x78] sm:$0xff] }
  0x11   :  { %51 = vst.msk [vmem:[#allocation2 + $0x100] sm:$0xff] %vm18_vm1, %v1424_v3  ;;  %52 = vst.msk [vmem:[#allocation2 + $0x108] sm:$0xff] %vm18_vm1, %v1424_v3  ;;  %1335 = vmatmul.mubr.msk.f32.gmra.mrb[6].mxu0 %vm18_vm1, %v154_v16  ;;  %1383 = vmatmul.mubr.msk.f32.gmra.mrb[6].mxu1 %vm18_vm1, %v186_v17  ;;  %v194_v33 = vld [vmem:[%s2238_s0 + $0x178] sm:$0xff]  ;;  %v163_v34 = vld [vmem:[%s2238_s0 + $0x80] sm:$0xff] }
  0x12   :  { %53 = vst.msk [vmem:[#allocation2 + $0x110] sm:$0xff] %vm18_vm1, %v1424_v3  ;;  %54 = vst.msk [vmem:[#allocation2 + $0x118] sm:$0xff] %vm18_vm1, %v1424_v3  ;;  %1337 = vmatprep.mubr.msk.f32.mxu0 %vm18_vm1, %v155_v18  ;;  %1385 = vmatprep.mubr.msk.f32.mxu1 %vm18_vm1, %v187_v19  ;;  %v195_v35 = vld [vmem:[%s2238_s0 + $0x180] sm:$0xff]  ;;  %v164_v36 = vld [vmem:[%s2238_s0 + $0x88] sm:$0xff] }
  0x13   :  { %55 = vst.msk [vmem:[#allocation2 + $0x120] sm:$0xff] %vm18_vm1, %v1424_v3  ;;  %56 = vst.msk [vmem:[#allocation2 + $0x128] sm:$0xff] %vm18_vm1, %v1424_v3  ;;  %v196_v37 = vld [vmem:[%s2238_s0 + $0x188] sm:$0xff]  ;;  %v165_v38 = vld [vmem:[%s2238_s0 + $0x90] sm:$0xff] }
  0x14   :  { %57 = vst.msk [vmem:[#allocation2 + $0x130] sm:$0xff] %vm18_vm1, %v1424_v3  ;;  %58 = vst.msk [vmem:[#allocation2 + $0x138] sm:$0xff] %vm18_vm1, %v1424_v3  ;;  %v197_v39 = vld [vmem:[%s2238_s0 + $0x190] sm:$0xff]  ;;  %v166_v40 = vld [vmem:[%s2238_s0 + $0x98] sm:$0xff] }
  0x15   :  { %59 = vst.msk [vmem:[#allocation2 + $0x140] sm:$0xff] %vm18_vm1, %v1424_v3  ;;  %60 = vst.msk [vmem:[#allocation2 + $0x148] sm:$0xff] %vm18_vm1, %v1424_v3  ;;  %1338 = vmatmul.mubr.msk.f32.gmra.mrb[8].mxu0 %vm18_vm1, %v156_v20  ;;  %1386 = vmatmul.mubr.msk.f32.gmra.mrb[8].mxu1 %vm18_vm1, %v188_v21  ;;  %v198_v41 = vld [vmem:[%s2238_s0 + $0x198] sm:$0xff]  ;;  %v167_v42 = vld [vmem:[%s2238_s0 + $0xa0] sm:$0xff] }
  0x16   :  { %61 = vst.msk [vmem:[#allocation2 + $0x150] sm:$0xff] %vm18_vm1, %v1424_v3  ;;  %62 = vst.msk [vmem:[#allocation2 + $0x158] sm:$0xff] %vm18_vm1, %v1424_v3  ;;  %1340 = vmatprep.mubr.msk.f32.mxu0 %vm18_vm1, %v157_v22  ;;  %1388 = vmatprep.mubr.msk.f32.mxu1 %vm18_vm1, %v189_v23  ;;  %v199_v43 = vld [vmem:[%s2238_s0 + $0x1a0] sm:$0xff]  ;;  %v168_v44 = vld [vmem:[%s2238_s0 + $0xa8] sm:$0xff] }
  0x17   :  { %63 = vst.msk [vmem:[#allocation2 + $0x160] sm:$0xff] %vm18_vm1, %v1424_v3  ;;  %64 = vst.msk [vmem:[#allocation2 + $0x168] sm:$0xff] %vm18_vm1, %v1424_v3  ;;  %v200_v45 = vld [vmem:[%s2238_s0 + $0x1a8] sm:$0xff]  ;;  %v169_v46 = vld [vmem:[%s2238_s0 + $0xb0] sm:$0xff] }
  0x18   :  { %65 = vst.msk [vmem:[#allocation2 + $0x170] sm:$0xff] %vm18_vm1, %v1424_v3  ;;  %66 = vst.msk [vmem:[#allocation2 + $0x178] sm:$0xff] %vm18_vm1, %v1424_v3  ;;  %v201_v47 = vld [vmem:[%s2238_s0 + $0x1b0] sm:$0xff]  ;;  %v170_v48 = vld [vmem:[%s2238_s0 + $0xb8] sm:$0xff] }
  0x19   :  { %67 = vst.msk [vmem:[#allocation2 + $0x180] sm:$0xff] %vm18_vm1, %v1424_v3  ;;  %68 = vst.msk [vmem:[#allocation2 + $0x188] sm:$0xff] %vm18_vm1, %v1424_v3  ;;  %1341 = vmatmul.mubr.msk.f32.gmra.mrb[10].mxu0 %vm18_vm1, %v158_v24  ;;  %1389 = vmatmul.mubr.msk.f32.gmra.mrb[10].mxu1 %vm18_vm1, %v190_v25  ;;  %v202_v49 = vld [vmem:[%s2238_s0 + $0x1b8] sm:$0xff]  ;;  %v171_v50 = vld [vmem:[%s2238_s0 + $0xc0] sm:$0xff] }
  0x1a   :  { %69 = vst.msk [vmem:[#allocation2 + $0x190] sm:$0xff] %vm18_vm1, %v1424_v3  ;;  %70 = vst.msk [vmem:[#allocation2 + $0x198] sm:$0xff] %vm18_vm1, %v1424_v3  ;;  %1343 = vmatprep.mubr.msk.f32.mxu0 %vm18_vm1, %v159_v26  ;;  %1391 = vmatprep.mubr.msk.f32.mxu1 %vm18_vm1, %v191_v27  ;;  %v203_v51 = vld [vmem:[%s2238_s0 + $0x1c0] sm:$0xff]  ;;  %v172_v52 = vld [vmem:[%s2238_s0 + $0xc8] sm:$0xff] }
  0x1b   :  { %71 = vst.msk [vmem:[#allocation2 + $0x1a0] sm:$0xff] %vm18_vm1, %v1424_v3  ;;  %72 = vst.msk [vmem:[#allocation2 + $0x1a8] sm:$0xff] %vm18_vm1, %v1424_v3  ;;  %v204_v53 = vld [vmem:[%s2238_s0 + $0x1c8] sm:$0xff]  ;;  %v173_v54 = vld [vmem:[%s2238_s0 + $0xd0] sm:$0xff] }
  0x1c   :  { %73 = vst.msk [vmem:[#allocation2 + $0x1b0] sm:$0xff] %vm18_vm1, %v1424_v3  ;;  %74 = vst.msk [vmem:[#allocation2 + $0x1b8] sm:$0xff] %vm18_vm1, %v1424_v3  ;;  %v205_v55 = vld [vmem:[%s2238_s0 + $0x1d0] sm:$0xff]  ;;  %v174_v56 = vld [vmem:[%s2238_s0 + $0xd8] sm:$0xff] }
  0x1d   :  { %75 = vst.msk [vmem:[#allocation2 + $0x1c0] sm:$0xff] %vm18_vm1, %v1424_v3  ;;  %76 = vst.msk [vmem:[#allocation2 + $0x1c8] sm:$0xff] %vm18_vm1, %v1424_v3  ;;  %1344 = vmatmul.mubr.msk.f32.gmra.mrb[12].mxu0 %vm18_vm1, %v160_v28  ;;  %1392 = vmatmul.mubr.msk.f32.gmra.mrb[12].mxu1 %vm18_vm1, %v192_v29  ;;  %v206_v57 = vld [vmem:[%s2238_s0 + $0x1d8] sm:$0xff]  ;;  %v175_v58 = vld [vmem:[%s2238_s0 + $0xe0] sm:$0xff] }
  0x1e   :  { %77 = vst.msk [vmem:[#allocation2 + $0x1d0] sm:$0xff] %vm18_vm1, %v1424_v3  ;;  %78 = vst.msk [vmem:[#allocation2 + $0x1d8] sm:$0xff] %vm18_vm1, %v1424_v3  ;;  %1346 = vmatprep.mubr.msk.f32.mxu0 %vm18_vm1, %v161_v30  ;;  %1394 = vmatprep.mubr.msk.f32.mxu1 %vm18_vm1, %v193_v31  ;;  %v207_v59 = vld [vmem:[%s2238_s0 + $0x1e0] sm:$0xff]  ;;  %v176_v60 = vld [vmem:[%s2238_s0 + $0xe8] sm:$0xff] }
  0x1f   :  { %79 = vst.msk [vmem:[#allocation2 + $0x1e0] sm:$0xff] %vm18_vm1, %v1424_v3  ;;  %80 = vst.msk [vmem:[#allocation2 + $0x1e8] sm:$0xff] %vm18_vm1, %v1424_v3  ;;  %v208_v61 = vld [vmem:[%s2238_s0 + $0x1e8] sm:$0xff]  ;;  %v177_v62 = vld [vmem:[%s2238_s0 + $0xf0] sm:$0xff] }
  0x20   :  { %81 = vst.msk [vmem:[#allocation2 + $0x1f0] sm:$0xff] %vm18_vm1, %v1424_v3  ;;  %82 = vst.msk [vmem:[#allocation2 + $0x1f8] sm:$0xff] %vm18_vm1, %v1424_v3  ;;  %v209_v63 = vld [vmem:[%s2238_s0 + $0x1f0] sm:$0xff]  ;;  %v178_v0 = vld [vmem:[%s2238_s0 + $0xf8] sm:$0xff] }
  0x21   :  { %1347 = vmatmul.mubr.msk.f32.gmra.mrb[14].mxu0 %vm18_vm1, %v162_v32  ;;  %1395 = vmatmul.mubr.msk.f32.gmra.mrb[14].mxu1 %vm18_vm1, %v194_v33  ;;  %v210_v1 = vld [vmem:[%s2238_s0 + $0x1f8] sm:$0xff]  ;;  %v84_v2 = vld [vmem:[#allocation2 + $0x8] sm:$0xff]  ;;  %v83_v4 = vld [vmem:[#allocation2] sm:$0xff] }
  0x22   :  { %1349 = vmatprep.mubr.msk.f32.mxu0 %vm18_vm1, %v163_v34  ;;  %1397 = vmatprep.mubr.msk.f32.mxu1 %vm18_vm1, %v195_v35  ;;  %v116_v3 = vld [vmem:[#allocation2 + $0x108] sm:$0xff]  ;;  %v115_v5 = vld [vmem:[#allocation2 + $0x100] sm:$0xff]  ;;  %v86_v14 = vld [vmem:[#allocation2 + $0x18] sm:$0xff] }
  0x23   :  { %v118_v15 = vld [vmem:[#allocation2 + $0x118] sm:$0xff]  ;;  %v85_v16 = vld [vmem:[#allocation2 + $0x10] sm:$0xff]  ;;  %v88_v26 = vld [vmem:[#allocation2 + $0x28] sm:$0xff] }
  0x24   :  { %v117_v17 = vld [vmem:[#allocation2 + $0x110] sm:$0xff]  ;;  %v120_v27 = vld [vmem:[#allocation2 + $0x128] sm:$0xff]  ;;  %v87_v28 = vld [vmem:[#allocation2 + $0x20] sm:$0xff] }
  0x25   :  { %1350 = vmatmul.mubr.msk.f32.gmra.mrb[16].mxu0 %vm18_vm1, %v164_v36  ;;  %1398 = vmatmul.mubr.msk.f32.gmra.mrb[16].mxu1 %vm18_vm1, %v196_v37  ;;  %v119_v29 = vld [vmem:[#allocation2 + $0x120] sm:$0xff]  ;;  %v90_v37 = vld [vmem:[#allocation2 + $0x38] sm:$0xff] }
  0x26   :  { %1352 = vmatprep.mubr.msk.f32.mxu0 %vm18_vm1, %v165_v38  ;;  %1400 = vmatprep.mubr.msk.f32.mxu1 %vm18_vm1, %v197_v39  ;;  %v1857_v30 = vld [vmem:[%s2239_s2] ss:$0 sm:$0xff]  ;;  %v122_v38 = vld [vmem:[#allocation2 + $0x138] sm:$0xff] }
  0x29   :  { %1353 = vmatmul.mubr.msk.f32.gmra.mrb[18].mxu0 %vm18_vm1, %v166_v40  ;;  %1401 = vmatmul.mubr.msk.f32.gmra.mrb[18].mxu1 %vm18_vm1, %v198_v41 }
  0x2a   :  { %1355 = vmatprep.mubr.msk.f32.mxu0 %vm18_vm1, %v167_v42  ;;  %1403 = vmatprep.mubr.msk.f32.mxu1 %vm18_vm1, %v199_v43  ;;  %v89_v43 = vld [vmem:[#allocation2 + $0x30] sm:$0xff] }
  0x2d   :  { %1356 = vmatmul.mubr.msk.f32.gmra.mrb[20].mxu0 %vm18_vm1, %v168_v44  ;;  %1404 = vmatmul.mubr.msk.f32.gmra.mrb[20].mxu1 %vm18_vm1, %v200_v45 }
  0x2e   :  { %1358 = vmatprep.mubr.msk.f32.mxu0 %vm18_vm1, %v169_v46  ;;  %1406 = vmatprep.mubr.msk.f32.mxu1 %vm18_vm1, %v201_v47 }
  0x31   :  { %1359 = vmatmul.mubr.msk.f32.gmra.mrb[22].mxu0 %vm18_vm1, %v170_v48  ;;  %1407 = vmatmul.mubr.msk.f32.gmra.mrb[22].mxu1 %vm18_vm1, %v202_v49  ;;  %v121_v48 = vld [vmem:[#allocation2 + $0x130] sm:$0xff] }
  0x32   :  { %1361 = vmatprep.mubr.msk.f32.mxu0 %vm18_vm1, %v171_v50  ;;  %1409 = vmatprep.mubr.msk.f32.mxu1 %vm18_vm1, %v203_v51 }
  0x35   :  { %1362 = vmatmul.mubr.msk.f32.gmra.mrb[24].mxu0 %vm18_vm1, %v172_v52  ;;  %1410 = vmatmul.mubr.msk.f32.gmra.mrb[24].mxu1 %vm18_vm1, %v204_v53 }
  0x36   :  { %1364 = vmatprep.mubr.msk.f32.mxu0 %vm18_vm1, %v173_v54  ;;  %1412 = vmatprep.mubr.msk.f32.mxu1 %vm18_vm1, %v205_v55 }
  0x39   :  { %1365 = vmatmul.mubr.msk.f32.gmra.mrb[26].mxu0 %vm18_vm1, %v174_v56  ;;  %1413 = vmatmul.mubr.msk.f32.gmra.mrb[26].mxu1 %vm18_vm1, %v206_v57 }
  0x3a   :  { %1367 = vmatprep.mubr.msk.f32.mxu0 %vm18_vm1, %v175_v58  ;;  %1415 = vmatprep.mubr.msk.f32.mxu1 %vm18_vm1, %v207_v59  ;;  %v92_v59 = vld [vmem:[#allocation2 + $0x48] sm:$0xff] }
  0x3d   :  { %1368 = vmatmul.mubr.msk.f32.gmra.mrb[28].mxu0 %vm18_vm1, %v176_v60  ;;  %1416 = vmatmul.mubr.msk.f32.gmra.mrb[28].mxu1 %vm18_vm1, %v208_v61  ;;  %v124_v60 = vld [vmem:[#allocation2 + $0x148] sm:$0xff] }
  0x3e   :  { %1370 = vmatprep.mubr.msk.f32.mxu0 %vm18_vm1, %v177_v62  ;;  %1418 = vmatprep.mubr.msk.f32.mxu1 %vm18_vm1, %v209_v63 }
  0x41   :  { %1371 = vmatmul.mubr.msk.f32.gmra.mrb[30].mxu0 %vm18_vm1, %v178_v0  ;;  %1419 = vmatmul.mubr.msk.f32.gmra.mrb[30].mxu1 %vm18_vm1, %v210_v1 }
  0xd8   :  { %v1327_v6 = vpop.f32.mrb[0].mxu0  ;;  %v1375_v7 = vpop.f32.mrb[0].mxu1 }
  0xd9   :  { %v795_v8 = vadd.f32 %v1327_v6, %v84_v2  ;;  %v827_v9 = vadd.f32 %v1375_v7, %v116_v3  ;;  %v475_v10 = vpop.f32.mrb[1].mxu0  ;;  %v635_v11 = vpop.f32.mrb[1].mxu1  ;;  %v91_v3 = vld [vmem:[#allocation2 + $0x40] sm:$0xff] }
  0xda   :  { %v794_v12 = vadd.f32 %v475_v10, %v83_v4  ;;  %v826_v13 = vadd.f32 %v635_v11, %v115_v5 }
  0xdb   :  { %859 = vst.msk [vmem:[#allocation2 + $0x8] sm:$0xff] %vm18_vm1, %v795_v8  ;;  %891 = vst.msk [vmem:[#allocation2 + $0x108] sm:$0xff] %vm18_vm1, %v827_v9  ;;  %v123_v8 = vld [vmem:[#allocation2 + $0x140] sm:$0xff] }
  0xdc   :  { %858 = vst.msk [vmem:[#allocation2] sm:$0xff] %vm18_vm1, %v794_v12  ;;  %890 = vst.msk [vmem:[#allocation2 + $0x100] sm:$0xff] %vm18_vm1, %v826_v13  ;;  %v1330_v18 = vpop.f32.mrb[2].mxu0  ;;  %v1378_v19 = vpop.f32.mrb[2].mxu1 }
  0xdd   :  { %v797_v20 = vadd.f32 %v1330_v18, %v86_v14  ;;  %v829_v21 = vadd.f32 %v1378_v19, %v118_v15  ;;  %v485_v22 = vpop.f32.mrb[3].mxu0  ;;  %v645_v23 = vpop.f32.mrb[3].mxu1  ;;  %v94_v19 = vld [vmem:[#allocation2 + $0x58] sm:$0xff] }
  0xde   :  { %v796_v24 = vadd.f32 %v485_v22, %v85_v16  ;;  %v828_v25 = vadd.f32 %v645_v23, %v117_v17 }
  0xdf   :  { %861 = vst.msk [vmem:[#allocation2 + $0x18] sm:$0xff] %vm18_vm1, %v797_v20  ;;  %893 = vst.msk [vmem:[#allocation2 + $0x118] sm:$0xff] %vm18_vm1, %v829_v21  ;;  %v126_v20 = vld [vmem:[#allocation2 + $0x158] sm:$0xff] }
  0xe0   :  { %860 = vst.msk [vmem:[#allocation2 + $0x10] sm:$0xff] %vm18_vm1, %v796_v24  ;;  %892 = vst.msk [vmem:[#allocation2 + $0x110] sm:$0xff] %vm18_vm1, %v828_v25  ;;  %v1333_v31 = vpop.f32.mrb[4].mxu0  ;;  %v1381_v32 = vpop.f32.mrb[4].mxu1 }
  0xe1   :  { %v799_v33 = vadd.f32 %v1333_v31, %v88_v26  ;;  %v831_v34 = vadd.f32 %v1381_v32, %v120_v27  ;;  %v495_v35 = vpop.f32.mrb[5].mxu0  ;;  %v655_v36 = vpop.f32.mrb[5].mxu1  ;;  %v93_v27 = vld [vmem:[#allocation2 + $0x50] sm:$0xff] }
  0xe2   :  { %v926_v39 = vld [vmem:[#allocation2 + $0x8] sm:$0xff]  ;;  %v798_v41 = vadd.f32 %v495_v35, %v87_v28  ;;  %v830_v42 = vadd.f32 %v655_v36, %v119_v29 }
  0xe3   :  { %v958_v40 = vld [vmem:[#allocation2 + $0x108] sm:$0xff]  ;;  %v997_v44 = vadd.f32 %v1857_v30, %v926_v39  ;;  %v925_v46 = vld [vmem:[#allocation2] sm:$0xff]  ;;  %863 = vst.msk [vmem:[#allocation2 + $0x28] sm:$0xff] %vm18_vm1, %v799_v33  ;;  %895 = vst.msk [vmem:[#allocation2 + $0x128] sm:$0xff] %vm18_vm1, %v831_v34 }
  0xe4   :  { %v1029_v45 = vadd.f32 %v1857_v30, %v958_v40  ;;  %v957_v47 = vld [vmem:[#allocation2 + $0x100] sm:$0xff]  ;;  %v996_v49 = vadd.f32 %v1857_v30, %v925_v46  ;;  %862 = vst.msk [vmem:[#allocation2 + $0x20] sm:$0xff] %vm18_vm1, %v798_v41  ;;  %894 = vst.msk [vmem:[#allocation2 + $0x120] sm:$0xff] %vm18_vm1, %v830_v42  ;;  %v1336_v51 = vpop.f32.mrb[6].mxu0  ;;  %v1384_v52 = vpop.f32.mrb[6].mxu1  ;;  %v125_v33 = vld [vmem:[#allocation2 + $0x150] sm:$0xff] }
  0xe5   :  { %v1028_v50 = vadd.f32 %v1857_v30, %v957_v47  ;;  %v1061_v53 = vmax.f32 %v997_v44, 0.0  ;;  %v801_v55 = vadd.f32 %v1336_v51, %v90_v37  ;;  %v833_v56 = vadd.f32 %v1384_v52, %v122_v38  ;;  %v505_v57 = vpop.f32.mrb[7].mxu0  ;;  %v665_v58 = vpop.f32.mrb[7].mxu1  ;;  %v96_v44 = vld [vmem:[#allocation2 + $0x68] sm:$0xff]  ;;  %v95_v52 = vld [vmem:[#allocation2 + $0x60] sm:$0xff] }
  0xe6   :  { %v1093_v54 = vmax.f32 %v1029_v45, 0.0  ;;  %v1060_v61 = vmax.f32 %v996_v49, 0.0  ;;  %v928_v63 = vld [vmem:[#allocation2 + $0x18] sm:$0xff]  ;;  %v800_v1 = vadd.f32 %v505_v57, %v89_v43  ;;  %v832_v2 = vadd.f32 %v665_v58, %v121_v48  ;;  %v128_v45 = vld [vmem:[#allocation2 + $0x168] sm:$0xff]  ;;  %v127_v57 = vld [vmem:[#allocation2 + $0x160] sm:$0xff] }
  0xe7   :  { %v1092_v62 = vmax.f32 %v1028_v50, 0.0  ;;  %v960_v0 = vld [vmem:[#allocation2 + $0x118] sm:$0xff]  ;;  %1125 = vst.msk [vmem:[%s2240_s3 + $0x8] sm:$0xff] %vm18_vm1, %v1061_v53  ;;  %v999_v4 = vadd.f32 %v1857_v30, %v928_v63  ;;  %v927_v6 = vld [vmem:[#allocation2 + $0x10] sm:$0xff]  ;;  %865 = vst.msk [vmem:[#allocation2 + $0x38] sm:$0xff] %vm18_vm1, %v801_v55 }
  0xe8   :  { %1157 = vst.msk [vmem:[%s2240_s3 + $0x108] sm:$0xff] %vm18_vm1, %v1093_v54  ;;  %v1031_v5 = vadd.f32 %v1857_v30, %v960_v0  ;;  %v959_v7 = vld [vmem:[#allocation2 + $0x110] sm:$0xff]  ;;  %897 = vst.msk [vmem:[#allocation2 + $0x138] sm:$0xff] %vm18_vm1, %v833_v56  ;;  %v998_v9 = vadd.f32 %v1857_v30, %v927_v6  ;;  %v1339_v11 = vpop.f32.mrb[8].mxu0  ;;  %v1387_v12 = vpop.f32.mrb[8].mxu1 }
  0xe9   :  { %1124 = vst.msk [vmem:[%s2240_s3] sm:$0xff] %vm18_vm1, %v1060_v61  ;;  %1156 = vst.msk [vmem:[%s2240_s3 + $0x100] sm:$0xff] %vm18_vm1, %v1092_v62  ;;  %v1030_v10 = vadd.f32 %v1857_v30, %v959_v7  ;;  %v1063_v13 = vmax.f32 %v999_v4, 0.0  ;;  %v803_v15 = vadd.f32 %v1339_v11, %v92_v59  ;;  %v835_v16 = vadd.f32 %v1387_v12, %v124_v60  ;;  %v515_v17 = vpop.f32.mrb[9].mxu0  ;;  %v675_v18 = vpop.f32.mrb[9].mxu1  ;;  %v98_v4 = vld [vmem:[#allocation2 + $0x78] sm:$0xff] }
  0xea   :  { %864 = vst.msk [vmem:[#allocation2 + $0x30] sm:$0xff] %vm18_vm1, %v800_v1  ;;  %896 = vst.msk [vmem:[#allocation2 + $0x130] sm:$0xff] %vm18_vm1, %v832_v2  ;;  %v1095_v14 = vmax.f32 %v1031_v5, 0.0  ;;  %v1062_v21 = vmax.f32 %v998_v9, 0.0  ;;  %v930_v23 = vld [vmem:[#allocation2 + $0x28] sm:$0xff]  ;;  %v802_v25 = vadd.f32 %v515_v17, %v91_v3  ;;  %v834_v26 = vadd.f32 %v675_v18, %v123_v8  ;;  %v130_v5 = vld [vmem:[#allocation2 + $0x178] sm:$0xff] }
  0xeb   :  { %v1094_v22 = vmax.f32 %v1030_v10, 0.0  ;;  %v962_v24 = vld [vmem:[#allocation2 + $0x128] sm:$0xff]  ;;  %1127 = vst.msk [vmem:[%s2240_s3 + $0x18] sm:$0xff] %vm18_vm1, %v1063_v13  ;;  %v1001_v28 = vadd.f32 %v1857_v30, %v930_v23  ;;  %v929_v31 = vld [vmem:[#allocation2 + $0x20] sm:$0xff]  ;;  %867 = vst.msk [vmem:[#allocation2 + $0x48] sm:$0xff] %vm18_vm1, %v803_v15 }
  0xec   :  { %1159 = vst.msk [vmem:[%s2240_s3 + $0x118] sm:$0xff] %vm18_vm1, %v1095_v14  ;;  %v1033_v29 = vadd.f32 %v1857_v30, %v962_v24  ;;  %v961_v32 = vld [vmem:[#allocation2 + $0x120] sm:$0xff]  ;;  %899 = vst.msk [vmem:[#allocation2 + $0x148] sm:$0xff] %vm18_vm1, %v835_v16  ;;  %v1000_v34 = vadd.f32 %v1857_v30, %v929_v31  ;;  %v1342_v36 = vpop.f32.mrb[10].mxu0  ;;  %v1390_v37 = vpop.f32.mrb[10].mxu1  ;;  %v97_v12 = vld [vmem:[#allocation2 + $0x70] sm:$0xff] }
  0xed   :  { %1126 = vst.msk [vmem:[%s2240_s3 + $0x10] sm:$0xff] %vm18_vm1, %v1062_v21  ;;  %1158 = vst.msk [vmem:[%s2240_s3 + $0x110] sm:$0xff] %vm18_vm1, %v1094_v22  ;;  %v1032_v35 = vadd.f32 %v1857_v30, %v961_v32  ;;  %v1065_v38 = vmax.f32 %v1001_v28, 0.0  ;;  %v805_v40 = vadd.f32 %v1342_v36, %v94_v19  ;;  %v837_v41 = vadd.f32 %v1390_v37, %v126_v20  ;;  %v525_v42 = vpop.f32.mrb[11].mxu0  ;;  %v685_v43 = vpop.f32.mrb[11].mxu1  ;;  %v129_v17 = vld [vmem:[#allocation2 + $0x170] sm:$0xff] }
  0xee   :  { %866 = vst.msk [vmem:[#allocation2 + $0x40] sm:$0xff] %vm18_vm1, %v802_v25  ;;  %898 = vst.msk [vmem:[#allocation2 + $0x140] sm:$0xff] %vm18_vm1, %v834_v26  ;;  %v1097_v39 = vmax.f32 %v1033_v29, 0.0  ;;  %v1064_v46 = vmax.f32 %v1000_v34, 0.0  ;;  %v932_v48 = vld [vmem:[#allocation2 + $0x38] sm:$0xff]  ;;  %v804_v50 = vadd.f32 %v525_v42, %v93_v27  ;;  %v836_v51 = vadd.f32 %v685_v43, %v125_v33  ;;  %v100_v28 = vld [vmem:[#allocation2 + $0x88] sm:$0xff] }
  0xef   :  { %v1096_v47 = vmax.f32 %v1032_v35, 0.0  ;;  %v964_v49 = vld [vmem:[#allocation2 + $0x138] sm:$0xff]  ;;  %1129 = vst.msk [vmem:[%s2240_s3 + $0x28] sm:$0xff] %vm18_vm1, %v1065_v38  ;;  %v1003_v53 = vadd.f32 %v1857_v30, %v932_v48  ;;  %869 = vst.msk [vmem:[#allocation2 + $0x58] sm:$0xff] %vm18_vm1, %v805_v40  ;;  %v132_v29 = vld [vmem:[#allocation2 + $0x188] sm:$0xff] }
  0xf0   :  { %1161 = vst.msk [vmem:[%s2240_s3 + $0x128] sm:$0xff] %vm18_vm1, %v1097_v39  ;;  %v1035_v54 = vadd.f32 %v1857_v30, %v964_v49  ;;  %901 = vst.msk [vmem:[#allocation2 + $0x158] sm:$0xff] %vm18_vm1, %v837_v41  ;;  %v1345_v60 = vpop.f32.mrb[12].mxu0  ;;  %v1393_v61 = vpop.f32.mrb[12].mxu1  ;;  %v99_v37 = vld [vmem:[#allocation2 + $0x80] sm:$0xff] }
  0xf1   :  { %v931_v55 = vld [vmem:[#allocation2 + $0x30] sm:$0xff]  ;;  %1128 = vst.msk [vmem:[%s2240_s3 + $0x20] sm:$0xff] %vm18_vm1, %v1064_v46  ;;  %1160 = vst.msk [vmem:[%s2240_s3 + $0x120] sm:$0xff] %vm18_vm1, %v1096_v47  ;;  %v1067_v62 = vmax.f32 %v1003_v53, 0.0  ;;  %v807_v0 = vadd.f32 %v1345_v60, %v96_v44  ;;  %v839_v1 = vadd.f32 %v1393_v61, %v128_v45  ;;  %v535_v2 = vpop.f32.mrb[13].mxu0  ;;  %v695_v3 = vpop.f32.mrb[13].mxu1 }
  0xf2   :  { %v963_v56 = vld [vmem:[#allocation2 + $0x130] sm:$0xff]  ;;  %v1002_v58 = vadd.f32 %v1857_v30, %v931_v55  ;;  %868 = vst.msk [vmem:[#allocation2 + $0x50] sm:$0xff] %vm18_vm1, %v804_v50  ;;  %900 = vst.msk [vmem:[#allocation2 + $0x150] sm:$0xff] %vm18_vm1, %v836_v51  ;;  %v1099_v63 = vmax.f32 %v1035_v54, 0.0  ;;  %v934_v8 = vld [vmem:[#allocation2 + $0x48] sm:$0xff]  ;;  %v806_v10 = vadd.f32 %v535_v2, %v95_v52  ;;  %v838_v11 = vadd.f32 %v695_v3, %v127_v57 }
  0xf3   :  { %v1034_v59 = vadd.f32 %v1857_v30, %v963_v56  ;;  %v966_v9 = vld [vmem:[#allocation2 + $0x148] sm:$0xff]  ;;  %1131 = vst.msk [vmem:[%s2240_s3 + $0x38] sm:$0xff] %vm18_vm1, %v1067_v62  ;;  %v1005_v13 = vadd.f32 %v1857_v30, %v934_v8  ;;  %871 = vst.msk [vmem:[#allocation2 + $0x68] sm:$0xff] %vm18_vm1, %v807_v0  ;;  %v131_v42 = vld [vmem:[#allocation2 + $0x180] sm:$0xff] }
  0xf4   :  { %v1066_v6 = vmax.f32 %v1002_v58, 0.0  ;;  %1163 = vst.msk [vmem:[%s2240_s3 + $0x138] sm:$0xff] %vm18_vm1, %v1099_v63  ;;  %v1037_v14 = vadd.f32 %v1857_v30, %v966_v9  ;;  %903 = vst.msk [vmem:[#allocation2 + $0x168] sm:$0xff] %vm18_vm1, %v839_v1  ;;  %v1348_v20 = vpop.f32.mrb[14].mxu0  ;;  %v1396_v21 = vpop.f32.mrb[14].mxu1  ;;  %v102_v53 = vld [vmem:[#allocation2 + $0x98] sm:$0xff] }
  0xf5   :  { %v1098_v7 = vmax.f32 %v1034_v59, 0.0  ;;  %v933_v15 = vld [vmem:[#allocation2 + $0x40] sm:$0xff]  ;;  %870 = vst.msk [vmem:[#allocation2 + $0x60] sm:$0xff] %vm18_vm1, %v806_v10  ;;  %902 = vst.msk [vmem:[#allocation2 + $0x160] sm:$0xff] %vm18_vm1, %v838_v11  ;;  %v1069_v22 = vmax.f32 %v1005_v13, 0.0  ;;  %v809_v24 = vadd.f32 %v1348_v20, %v98_v4  ;;  %v841_v25 = vadd.f32 %v1396_v21, %v130_v5  ;;  %v545_v26 = vpop.f32.mrb[15].mxu0 }
  0xf6   :  { %v965_v16 = vld [vmem:[#allocation2 + $0x140] sm:$0xff]  ;;  %1130 = vst.msk [vmem:[%s2240_s3 + $0x30] sm:$0xff] %vm18_vm1, %v1066_v6  ;;  %v1004_v18 = vadd.f32 %v1857_v30, %v933_v15  ;;  %v1101_v23 = vmax.f32 %v1037_v14, 0.0  ;;  %v705_v27 = vpop.f32.mrb[15].mxu1  ;;  %v936_v33 = vld [vmem:[#allocation2 + $0x58] sm:$0xff]  ;;  %v808_v35 = vadd.f32 %v545_v26, %v97_v12  ;;  %v101_v61 = vld [vmem:[#allocation2 + $0x90] sm:$0xff] }
  0xf7   :  { %1162 = vst.msk [vmem:[%s2240_s3 + $0x130] sm:$0xff] %vm18_vm1, %v1098_v7  ;;  %v1036_v19 = vadd.f32 %v1857_v30, %v965_v16  ;;  %v968_v34 = vld [vmem:[#allocation2 + $0x158] sm:$0xff]  ;;  %v840_v36 = vadd.f32 %v705_v27, %v129_v17  ;;  %1133 = vst.msk [vmem:[%s2240_s3 + $0x48] sm:$0xff] %vm18_vm1, %v1069_v22  ;;  %v1007_v38 = vadd.f32 %v1857_v30, %v936_v33  ;;  %v133_v2 = vld [vmem:[#allocation2 + $0x190] sm:$0xff] }
  0xf8   :  { %v1068_v31 = vmax.f32 %v1004_v18, 0.0  ;;  %1165 = vst.msk [vmem:[%s2240_s3 + $0x148] sm:$0xff] %vm18_vm1, %v1101_v23  ;;  %v1039_v39 = vadd.f32 %v1857_v30, %v968_v34  ;;  %873 = vst.msk [vmem:[#allocation2 + $0x78] sm:$0xff] %vm18_vm1, %v809_v24  ;;  %v1351_v45 = vpop.f32.mrb[16].mxu0  ;;  %v1399_v46 = vpop.f32.mrb[16].mxu1  ;;  %v134_v54 = vld [vmem:[#allocation2 + $0x198] sm:$0xff] }
  0xf9   :  { %v1100_v32 = vmax.f32 %v1036_v19, 0.0  ;;  %v935_v40 = vld [vmem:[#allocation2 + $0x50] sm:$0xff]  ;;  %905 = vst.msk [vmem:[#allocation2 + $0x178] sm:$0xff] %vm18_vm1, %v841_v25  ;;  %872 = vst.msk [vmem:[#allocation2 + $0x70] sm:$0xff] %vm18_vm1, %v808_v35  ;;  %v1071_v47 = vmax.f32 %v1007_v38, 0.0  ;;  %v811_v49 = vadd.f32 %v1351_v45, %v100_v28  ;;  %v843_v50 = vadd.f32 %v1399_v46, %v132_v29  ;;  %v555_v51 = vpop.f32.mrb[17].mxu0 }
  0xfa   :  { %v967_v41 = vld [vmem:[#allocation2 + $0x150] sm:$0xff]  ;;  %1132 = vst.msk [vmem:[%s2240_s3 + $0x40] sm:$0xff] %vm18_vm1, %v1068_v31  ;;  %v1006_v43 = vadd.f32 %v1857_v30, %v935_v40  ;;  %904 = vst.msk [vmem:[#allocation2 + $0x170] sm:$0xff] %vm18_vm1, %v840_v36  ;;  %v1103_v48 = vmax.f32 %v1039_v39, 0.0  ;;  %v715_v52 = vpop.f32.mrb[17].mxu1  ;;  %v938_v57 = vld [vmem:[#allocation2 + $0x68] sm:$0xff]  ;;  %v810_v59 = vadd.f32 %v555_v51, %v99_v37 }
  0xfb   :  { %1164 = vst.msk [vmem:[%s2240_s3 + $0x140] sm:$0xff] %vm18_vm1, %v1100_v32  ;;  %v1038_v44 = vadd.f32 %v1857_v30, %v967_v41  ;;  %v970_v58 = vld [vmem:[#allocation2 + $0x168] sm:$0xff]  ;;  %v842_v60 = vadd.f32 %v715_v52, %v131_v42  ;;  %1135 = vst.msk [vmem:[%s2240_s3 + $0x58] sm:$0xff] %vm18_vm1, %v1071_v47  ;;  %v1009_v62 = vadd.f32 %v1857_v30, %v938_v57  ;;  %v103_v21 = vld [vmem:[#allocation2 + $0xa0] sm:$0xff] }
  0xfc   :  { %v1070_v55 = vmax.f32 %v1006_v43, 0.0  ;;  %1167 = vst.msk [vmem:[%s2240_s3 + $0x158] sm:$0xff] %vm18_vm1, %v1103_v48  ;;  %v1041_v63 = vadd.f32 %v1857_v30, %v970_v58  ;;  %v937_v0 = vld [vmem:[#allocation2 + $0x60] sm:$0xff]  ;;  %875 = vst.msk [vmem:[#allocation2 + $0x88] sm:$0xff] %vm18_vm1, %v811_v49  ;;  %v1354_v5 = vpop.f32.mrb[18].mxu0  ;;  %v1402_v6 = vpop.f32.mrb[18].mxu1 }
  0xfd   :  { %v1102_v56 = vmax.f32 %v1038_v44, 0.0  ;;  %v969_v1 = vld [vmem:[#allocation2 + $0x160] sm:$0xff]  ;;  %907 = vst.msk [vmem:[#allocation2 + $0x188] sm:$0xff] %vm18_vm1, %v843_v50  ;;  %v1008_v3 = vadd.f32 %v1857_v30, %v937_v0  ;;  %874 = vst.msk [vmem:[#allocation2 + $0x80] sm:$0xff] %vm18_vm1, %v810_v59  ;;  %v1073_v7 = vmax.f32 %v1009_v62, 0.0  ;;  %v813_v9 = vadd.f32 %v1354_v5, %v102_v53  ;;  %v565_v11 = vpop.f32.mrb[19].mxu0 }
  0xfe   :  { %1134 = vst.msk [vmem:[%s2240_s3 + $0x50] sm:$0xff] %vm18_vm1, %v1070_v55  ;;  %v1040_v4 = vadd.f32 %v1857_v30, %v969_v1  ;;  %906 = vst.msk [vmem:[#allocation2 + $0x180] sm:$0xff] %vm18_vm1, %v842_v60  ;;  %v1105_v8 = vmax.f32 %v1041_v63, 0.0  ;;  %v845_v10 = vadd.f32 %v1402_v6, %v134_v54  ;;  %v725_v12 = vpop.f32.mrb[19].mxu1  ;;  %v104_v13 = vld [vmem:[#allocation2 + $0xa8] sm:$0xff]  ;;  %v812_v19 = vadd.f32 %v565_v11, %v101_v61  ;;  %v135_v26 = vld [vmem:[#allocation2 + $0x1a0] sm:$0xff] }
  0xff   :  { %1166 = vst.msk [vmem:[%s2240_s3 + $0x150] sm:$0xff] %vm18_vm1, %v1102_v56  ;;  %v136_v14 = vld [vmem:[#allocation2 + $0x1a8] sm:$0xff]  ;;  %v1072_v15 = vmax.f32 %v1008_v3, 0.0  ;;  %v940_v17 = vld [vmem:[#allocation2 + $0x78] sm:$0xff]  ;;  %v844_v20 = vadd.f32 %v725_v12, %v133_v2  ;;  %1137 = vst.msk [vmem:[%s2240_s3 + $0x68] sm:$0xff] %vm18_vm1, %v1073_v7 }
 0x100   :  { %v1104_v16 = vmax.f32 %v1040_v4, 0.0  ;;  %v972_v18 = vld [vmem:[#allocation2 + $0x178] sm:$0xff]  ;;  %1169 = vst.msk [vmem:[%s2240_s3 + $0x168] sm:$0xff] %vm18_vm1, %v1105_v8  ;;  %v1011_v22 = vadd.f32 %v1857_v30, %v940_v17  ;;  %v939_v24 = vld [vmem:[#allocation2 + $0x70] sm:$0xff]  ;;  %877 = vst.msk [vmem:[#allocation2 + $0x98] sm:$0xff] %vm18_vm1, %v813_v9  ;;  %v1357_v29 = vpop.f32.mrb[20].mxu0 }
 0x101   :  { %v1043_v23 = vadd.f32 %v1857_v30, %v972_v18  ;;  %v971_v25 = vld [vmem:[#allocation2 + $0x170] sm:$0xff]  ;;  %909 = vst.msk [vmem:[#allocation2 + $0x198] sm:$0xff] %vm18_vm1, %v845_v10  ;;  %1136 = vst.msk [vmem:[%s2240_s3 + $0x60] sm:$0xff] %vm18_vm1, %v1072_v15  ;;  %v1010_v27 = vadd.f32 %v1857_v30, %v939_v24  ;;  %v1405_v31 = vpop.f32.mrb[20].mxu1  ;;  %v815_v34 = vadd.f32 %v1357_v29, %v104_v13  ;;  %v575_v36 = vpop.f32.mrb[21].mxu0  ;;  %v106_v38 = vld [vmem:[#allocation2 + $0xb8] sm:$0xff] }
 0x102   :  { %1168 = vst.msk [vmem:[%s2240_s3 + $0x160] sm:$0xff] %vm18_vm1, %v1104_v16  ;;  %v1042_v28 = vadd.f32 %v1857_v30, %v971_v25  ;;  %876 = vst.msk [vmem:[#allocation2 + $0x90] sm:$0xff] %vm18_vm1, %v812_v19  ;;  %v1075_v32 = vmax.f32 %v1011_v22, 0.0  ;;  %v847_v35 = vadd.f32 %v1405_v31, %v136_v14  ;;  %v735_v37 = vpop.f32.mrb[21].mxu1  ;;  %v138_v39 = vld [vmem:[#allocation2 + $0x1b8] sm:$0xff]  ;;  %v814_v44 = vadd.f32 %v575_v36, %v103_v21  ;;  %v105_v46 = vld [vmem:[#allocation2 + $0xb0] sm:$0xff] }
 0x103   :  { %908 = vst.msk [vmem:[#allocation2 + $0x190] sm:$0xff] %vm18_vm1, %v844_v20  ;;  %v1107_v33 = vmax.f32 %v1043_v23, 0.0  ;;  %v1074_v40 = vmax.f32 %v1010_v27, 0.0  ;;  %v942_v42 = vld [vmem:[#allocation2 + $0x88] sm:$0xff]  ;;  %v846_v45 = vadd.f32 %v735_v37, %v135_v26  ;;  %879 = vst.msk [vmem:[#allocation2 + $0xa8] sm:$0xff] %vm18_vm1, %v815_v34  ;;  %v137_v51 = vld [vmem:[#allocation2 + $0x1b0] sm:$0xff] }
 0x104   :  { %v1106_v41 = vmax.f32 %v1042_v28, 0.0  ;;  %v974_v43 = vld [vmem:[#allocation2 + $0x188] sm:$0xff]  ;;  %1139 = vst.msk [vmem:[%s2240_s3 + $0x78] sm:$0xff] %vm18_vm1, %v1075_v32  ;;  %v1013_v47 = vadd.f32 %v1857_v30, %v942_v42  ;;  %v941_v49 = vld [vmem:[#allocation2 + $0x80] sm:$0xff]  ;;  %911 = vst.msk [vmem:[#allocation2 + $0x1a8] sm:$0xff] %vm18_vm1, %v847_v35  ;;  %v1360_v54 = vpop.f32.mrb[22].mxu0 }
 0x105   :  { %1171 = vst.msk [vmem:[%s2240_s3 + $0x178] sm:$0xff] %vm18_vm1, %v1107_v33  ;;  %v1045_v48 = vadd.f32 %v1857_v30, %v974_v43  ;;  %v973_v50 = vld [vmem:[#allocation2 + $0x180] sm:$0xff]  ;;  %1138 = vst.msk [vmem:[%s2240_s3 + $0x70] sm:$0xff] %vm18_vm1, %v1074_v40  ;;  %v1012_v52 = vadd.f32 %v1857_v30, %v941_v49  ;;  %v1408_v55 = vpop.f32.mrb[22].mxu1  ;;  %v817_v58 = vadd.f32 %v1360_v54, %v106_v38  ;;  %v585_v60 = vpop.f32.mrb[23].mxu0  ;;  %v108_v62 = vld [vmem:[#allocation2 + $0xc8] sm:$0xff] }
 0x106   :  { %1170 = vst.msk [vmem:[%s2240_s3 + $0x170] sm:$0xff] %vm18_vm1, %v1106_v41  ;;  %v1044_v53 = vadd.f32 %v1857_v30, %v973_v50  ;;  %878 = vst.msk [vmem:[#allocation2 + $0xa0] sm:$0xff] %vm18_vm1, %v814_v44  ;;  %v1077_v56 = vmax.f32 %v1013_v47, 0.0  ;;  %v849_v59 = vadd.f32 %v1408_v55, %v138_v39  ;;  %v745_v61 = vpop.f32.mrb[23].mxu1  ;;  %v140_v63 = vld [vmem:[#allocation2 + $0x1c8] sm:$0xff]  ;;  %v816_v4 = vadd.f32 %v585_v60, %v105_v46  ;;  %v107_v6 = vld [vmem:[#allocation2 + $0xc0] sm:$0xff] }
 0x107   :  { %910 = vst.msk [vmem:[#allocation2 + $0x1a0] sm:$0xff] %vm18_vm1, %v846_v45  ;;  %v1109_v57 = vmax.f32 %v1045_v48, 0.0  ;;  %v1076_v0 = vmax.f32 %v1012_v52, 0.0  ;;  %v944_v2 = vld [vmem:[#allocation2 + $0x98] sm:$0xff]  ;;  %v848_v5 = vadd.f32 %v745_v61, %v137_v51  ;;  %881 = vst.msk [vmem:[#allocation2 + $0xb8] sm:$0xff] %vm18_vm1, %v817_v58  ;;  %v139_v11 = vld [vmem:[#allocation2 + $0x1c0] sm:$0xff] }
 0x108   :  { %v1108_v1 = vmax.f32 %v1044_v53, 0.0  ;;  %v976_v3 = vld [vmem:[#allocation2 + $0x198] sm:$0xff]  ;;  %1141 = vst.msk [vmem:[%s2240_s3 + $0x88] sm:$0xff] %vm18_vm1, %v1077_v56  ;;  %v1015_v7 = vadd.f32 %v1857_v30, %v944_v2  ;;  %913 = vst.msk [vmem:[#allocation2 + $0x1b8] sm:$0xff] %vm18_vm1, %v849_v59  ;;  %v1363_v14 = vpop.f32.mrb[24].mxu0  ;;  %v1411_v15 = vpop.f32.mrb[24].mxu1 }
 0x109   :  { %1173 = vst.msk [vmem:[%s2240_s3 + $0x188] sm:$0xff] %vm18_vm1, %v1109_v57  ;;  %v1047_v8 = vadd.f32 %v1857_v30, %v976_v3  ;;  %v943_v9 = vld [vmem:[#allocation2 + $0x90] sm:$0xff]  ;;  %1140 = vst.msk [vmem:[%s2240_s3 + $0x80] sm:$0xff] %vm18_vm1, %v1076_v0  ;;  %v819_v18 = vadd.f32 %v1363_v14, %v108_v62  ;;  %v851_v19 = vadd.f32 %v1411_v15, %v140_v63  ;;  %v595_v20 = vpop.f32.mrb[25].mxu0  ;;  %v755_v21 = vpop.f32.mrb[25].mxu1  ;;  %v110_v22 = vld [vmem:[#allocation2 + $0xd8] sm:$0xff] }
 0x10a   :  { %v975_v10 = vld [vmem:[#allocation2 + $0x190] sm:$0xff]  ;;  %1172 = vst.msk [vmem:[%s2240_s3 + $0x180] sm:$0xff] %vm18_vm1, %v1108_v1  ;;  %v1014_v12 = vadd.f32 %v1857_v30, %v943_v9  ;;  %880 = vst.msk [vmem:[#allocation2 + $0xb0] sm:$0xff] %vm18_vm1, %v816_v4  ;;  %v1079_v16 = vmax.f32 %v1015_v7, 0.0  ;;  %v142_v23 = vld [vmem:[#allocation2 + $0x1d8] sm:$0xff]  ;;  %v818_v28 = vadd.f32 %v595_v20, %v107_v6  ;;  %v850_v29 = vadd.f32 %v755_v21, %v139_v11 }
 0x10b   :  { %v1046_v13 = vadd.f32 %v1857_v30, %v975_v10  ;;  %912 = vst.msk [vmem:[#allocation2 + $0x1b0] sm:$0xff] %vm18_vm1, %v848_v5  ;;  %v1111_v17 = vmax.f32 %v1047_v8, 0.0  ;;  %v946_v26 = vld [vmem:[#allocation2 + $0xa8] sm:$0xff]  ;;  %v109_v31 = vld [vmem:[#allocation2 + $0xd0] sm:$0xff]  ;;  %883 = vst.msk [vmem:[#allocation2 + $0xc8] sm:$0xff] %vm18_vm1, %v819_v18 }
 0x10c   :  { %v1078_v24 = vmax.f32 %v1014_v12, 0.0  ;;  %v978_v27 = vld [vmem:[#allocation2 + $0x1a8] sm:$0xff]  ;;  %1143 = vst.msk [vmem:[%s2240_s3 + $0x98] sm:$0xff] %vm18_vm1, %v1079_v16  ;;  %v1017_v32 = vadd.f32 %v1857_v30, %v946_v26  ;;  %915 = vst.msk [vmem:[#allocation2 + $0x1c8] sm:$0xff] %vm18_vm1, %v851_v19  ;;  %v141_v36 = vld [vmem:[#allocation2 + $0x1d0] sm:$0xff]  ;;  %v1366_v39 = vpop.f32.mrb[26].mxu0 }
 0x10d   :  { %v1110_v25 = vmax.f32 %v1046_v13, 0.0  ;;  %1175 = vst.msk [vmem:[%s2240_s3 + $0x198] sm:$0xff] %vm18_vm1, %v1111_v17  ;;  %v1049_v33 = vadd.f32 %v1857_v30, %v978_v27  ;;  %v945_v34 = vld [vmem:[#allocation2 + $0xa0] sm:$0xff]  ;;  %882 = vst.msk [vmem:[#allocation2 + $0xc0] sm:$0xff] %vm18_vm1, %v818_v28  ;;  %v1414_v40 = vpop.f32.mrb[26].mxu1  ;;  %v821_v43 = vadd.f32 %v1366_v39, %v110_v22  ;;  %v605_v45 = vpop.f32.mrb[27].mxu0 }
 0x10e   :  { %v977_v35 = vld [vmem:[#allocation2 + $0x1a0] sm:$0xff]  ;;  %1142 = vst.msk [vmem:[%s2240_s3 + $0x90] sm:$0xff] %vm18_vm1, %v1078_v24  ;;  %v1016_v37 = vadd.f32 %v1857_v30, %v945_v34  ;;  %914 = vst.msk [vmem:[#allocation2 + $0x1c0] sm:$0xff] %vm18_vm1, %v850_v29  ;;  %v1081_v41 = vmax.f32 %v1017_v32, 0.0  ;;  %v853_v44 = vadd.f32 %v1414_v40, %v142_v23  ;;  %v765_v46 = vpop.f32.mrb[27].mxu1  ;;  %v112_v47 = vld [vmem:[#allocation2 + $0xe8] sm:$0xff]  ;;  %v820_v53 = vadd.f32 %v605_v45, %v109_v31 }
 0x10f   :  { %1174 = vst.msk [vmem:[%s2240_s3 + $0x190] sm:$0xff] %vm18_vm1, %v1110_v25  ;;  %v1048_v38 = vadd.f32 %v1857_v30, %v977_v35  ;;  %v1113_v42 = vmax.f32 %v1049_v33, 0.0  ;;  %v144_v48 = vld [vmem:[#allocation2 + $0x1e8] sm:$0xff]  ;;  %v948_v51 = vld [vmem:[#allocation2 + $0xb8] sm:$0xff]  ;;  %v852_v54 = vadd.f32 %v765_v46, %v141_v36  ;;  %v111_v55 = vld [vmem:[#allocation2 + $0xe0] sm:$0xff] }
 0x110   :  { %v1080_v49 = vmax.f32 %v1016_v37, 0.0  ;;  %v980_v52 = vld [vmem:[#allocation2 + $0x1b8] sm:$0xff]  ;;  %1145 = vst.msk [vmem:[%s2240_s3 + $0xa8] sm:$0xff] %vm18_vm1, %v1081_v41  ;;  %v1019_v56 = vadd.f32 %v1857_v30, %v948_v51  ;;  %885 = vst.msk [vmem:[#allocation2 + $0xd8] sm:$0xff] %vm18_vm1, %v821_v43  ;;  %v143_v60 = vld [vmem:[#allocation2 + $0x1e0] sm:$0xff]  ;;  %v1369_v63 = vpop.f32.mrb[28].mxu0 }
 0x111   :  { %v1112_v50 = vmax.f32 %v1048_v38, 0.0  ;;  %1177 = vst.msk [vmem:[%s2240_s3 + $0x1a8] sm:$0xff] %vm18_vm1, %v1113_v42  ;;  %v1051_v57 = vadd.f32 %v1857_v30, %v980_v52  ;;  %v947_v58 = vld [vmem:[#allocation2 + $0xb0] sm:$0xff]  ;;  %917 = vst.msk [vmem:[#allocation2 + $0x1d8] sm:$0xff] %vm18_vm1, %v853_v44  ;;  %v1417_v0 = vpop.f32.mrb[28].mxu1  ;;  %v823_v3 = vadd.f32 %v1369_v63, %v112_v47  ;;  %v615_v5 = vpop.f32.mrb[29].mxu0 }
 0x112   :  { %v979_v59 = vld [vmem:[#allocation2 + $0x1b0] sm:$0xff]  ;;  %1144 = vst.msk [vmem:[%s2240_s3 + $0xa0] sm:$0xff] %vm18_vm1, %v1080_v49  ;;  %v1018_v61 = vadd.f32 %v1857_v30, %v947_v58  ;;  %884 = vst.msk [vmem:[#allocation2 + $0xd0] sm:$0xff] %vm18_vm1, %v820_v53  ;;  %v1083_v1 = vmax.f32 %v1019_v56, 0.0  ;;  %v855_v4 = vadd.f32 %v1417_v0, %v144_v48  ;;  %v775_v6 = vpop.f32.mrb[29].mxu1  ;;  %v114_v7 = vld [vmem:[#allocation2 + $0xf8] sm:$0xff]  ;;  %v822_v13 = vadd.f32 %v615_v5, %v111_v55 }
 0x113   :  { %1176 = vst.msk [vmem:[%s2240_s3 + $0x1a0] sm:$0xff] %vm18_vm1, %v1112_v50  ;;  %v1050_v62 = vadd.f32 %v1857_v30, %v979_v59  ;;  %916 = vst.msk [vmem:[#allocation2 + $0x1d0] sm:$0xff] %vm18_vm1, %v852_v54  ;;  %v1115_v2 = vmax.f32 %v1051_v57, 0.0  ;;  %v146_v8 = vld [vmem:[#allocation2 + $0x1f8] sm:$0xff]  ;;  %v950_v11 = vld [vmem:[#allocation2 + $0xc8] sm:$0xff]  ;;  %v854_v14 = vadd.f32 %v775_v6, %v143_v60 }
 0x114   :  { %v1082_v9 = vmax.f32 %v1018_v61, 0.0  ;;  %v982_v12 = vld [vmem:[#allocation2 + $0x1c8] sm:$0xff]  ;;  %v113_v15 = vld [vmem:[#allocation2 + $0xf0] sm:$0xff]  ;;  %1147 = vst.msk [vmem:[%s2240_s3 + $0xb8] sm:$0xff] %vm18_vm1, %v1083_v1  ;;  %v1021_v16 = vadd.f32 %v1857_v30, %v950_v11  ;;  %v949_v18 = vld [vmem:[#allocation2 + $0xc0] sm:$0xff]  ;;  %v1372_v23 = vpop.f32.mrb[30].mxu0 }
 0x115   :  { %v1114_v10 = vmax.f32 %v1050_v62, 0.0  ;;  %1179 = vst.msk [vmem:[%s2240_s3 + $0x1b8] sm:$0xff] %vm18_vm1, %v1115_v2  ;;  %v1053_v17 = vadd.f32 %v1857_v30, %v982_v12  ;;  %v981_v19 = vld [vmem:[#allocation2 + $0x1c0] sm:$0xff]  ;;  %887 = vst.msk [vmem:[#allocation2 + $0xe8] sm:$0xff] %vm18_vm1, %v823_v3  ;;  %v145_v20 = vld [vmem:[#allocation2 + $0x1f0] sm:$0xff]  ;;  %v1020_v21 = vadd.f32 %v1857_v30, %v949_v18  ;;  %v1420_v24 = vpop.f32.mrb[30].mxu1  ;;  %v825_v27 = vadd.f32 %v1372_v23, %v114_v7 }
 0x116   :  { %919 = vst.msk [vmem:[#allocation2 + $0x1e8] sm:$0xff] %vm18_vm1, %v855_v4  ;;  %1146 = vst.msk [vmem:[%s2240_s3 + $0xb0] sm:$0xff] %vm18_vm1, %v1082_v9  ;;  %v1052_v22 = vadd.f32 %v1857_v30, %v981_v19  ;;  %v1085_v25 = vmax.f32 %v1021_v16, 0.0  ;;  %v857_v28 = vadd.f32 %v1420_v24, %v146_v8  ;;  %v625_v29 = vpop.f32.mrb[31].mxu0  ;;  %v785_v31 = vpop.f32.mrb[31].mxu1 }
 0x117   :  { %1178 = vst.msk [vmem:[%s2240_s3 + $0x1b0] sm:$0xff] %vm18_vm1, %v1114_v10  ;;  %886 = vst.msk [vmem:[#allocation2 + $0xe0] sm:$0xff] %vm18_vm1, %v822_v13  ;;  %v1117_v26 = vmax.f32 %v1053_v17, 0.0  ;;  %v1084_v32 = vmax.f32 %v1020_v21, 0.0  ;;  %v952_v34 = vld [vmem:[#allocation2 + $0xd8] sm:$0xff]  ;;  %v824_v36 = vadd.f32 %v625_v29, %v113_v15  ;;  %v856_v37 = vadd.f32 %v785_v31, %v145_v20 }
 0x118   :  { %918 = vst.msk [vmem:[#allocation2 + $0x1e0] sm:$0xff] %vm18_vm1, %v854_v14  ;;  %v1116_v33 = vmax.f32 %v1052_v22, 0.0  ;;  %v984_v35 = vld [vmem:[#allocation2 + $0x1d8] sm:$0xff]  ;;  %1149 = vst.msk [vmem:[%s2240_s3 + $0xc8] sm:$0xff] %vm18_vm1, %v1085_v25  ;;  %v1023_v38 = vadd.f32 %v1857_v30, %v952_v34 }
 0x119   :  { %1181 = vst.msk [vmem:[%s2240_s3 + $0x1c8] sm:$0xff] %vm18_vm1, %v1117_v26  ;;  %v1055_v39 = vadd.f32 %v1857_v30, %v984_v35  ;;  %v951_v40 = vld [vmem:[#allocation2 + $0xd0] sm:$0xff]  ;;  %889 = vst.msk [vmem:[#allocation2 + $0xf8] sm:$0xff] %vm18_vm1, %v825_v27 }
 0x11a   :  { %v983_v41 = vld [vmem:[#allocation2 + $0x1d0] sm:$0xff]  ;;  %921 = vst.msk [vmem:[#allocation2 + $0x1f8] sm:$0xff] %vm18_vm1, %v857_v28  ;;  %1148 = vst.msk [vmem:[%s2240_s3 + $0xc0] sm:$0xff] %vm18_vm1, %v1084_v32  ;;  %v1022_v42 = vadd.f32 %v1857_v30, %v951_v40  ;;  %v1087_v44 = vmax.f32 %v1023_v38, 0.0 }
 0x11b   :  { %1180 = vst.msk [vmem:[%s2240_s3 + $0x1c0] sm:$0xff] %vm18_vm1, %v1116_v33  ;;  %v1054_v43 = vadd.f32 %v1857_v30, %v983_v41  ;;  %888 = vst.msk [vmem:[#allocation2 + $0xf0] sm:$0xff] %vm18_vm1, %v824_v36  ;;  %v1119_v45 = vmax.f32 %v1055_v39, 0.0 }
 0x11c   :  { %920 = vst.msk [vmem:[#allocation2 + $0x1f0] sm:$0xff] %vm18_vm1, %v856_v37  ;;  %v1086_v46 = vmax.f32 %v1022_v42, 0.0  ;;  %v954_v48 = vld [vmem:[#allocation2 + $0xe8] sm:$0xff]  ;;  %1151 = vst.msk [vmem:[%s2240_s3 + $0xd8] sm:$0xff] %vm18_vm1, %v1087_v44 }
 0x11d   :  { %v1118_v47 = vmax.f32 %v1054_v43, 0.0  ;;  %v986_v49 = vld [vmem:[#allocation2 + $0x1e8] sm:$0xff]  ;;  %1183 = vst.msk [vmem:[%s2240_s3 + $0x1d8] sm:$0xff] %vm18_vm1, %v1119_v45  ;;  %v1025_v50 = vadd.f32 %v1857_v30, %v954_v48 }
 0x11e   :  { %v1057_v51 = vadd.f32 %v1857_v30, %v986_v49  ;;  %v953_v52 = vld [vmem:[#allocation2 + $0xe0] sm:$0xff]  ;;  %1150 = vst.msk [vmem:[%s2240_s3 + $0xd0] sm:$0xff] %vm18_vm1, %v1086_v46 }
 0x11f   :  { %v985_v53 = vld [vmem:[#allocation2 + $0x1e0] sm:$0xff]  ;;  %1182 = vst.msk [vmem:[%s2240_s3 + $0x1d0] sm:$0xff] %vm18_vm1, %v1118_v47  ;;  %v1024_v54 = vadd.f32 %v1857_v30, %v953_v52  ;;  %v1089_v56 = vmax.f32 %v1025_v50, 0.0 }
 0x120   :  { %v1056_v55 = vadd.f32 %v1857_v30, %v985_v53  ;;  %v1121_v57 = vmax.f32 %v1057_v51, 0.0  ;;  %v956_v60 = vld [vmem:[#allocation2 + $0xf8] sm:$0xff] }
 0x121   :  { %v1088_v58 = vmax.f32 %v1024_v54, 0.0  ;;  %v988_v61 = vld [vmem:[#allocation2 + $0x1f8] sm:$0xff]  ;;  %1153 = vst.msk [vmem:[%s2240_s3 + $0xe8] sm:$0xff] %vm18_vm1, %v1089_v56  ;;  %v1027_v62 = vadd.f32 %v1857_v30, %v956_v60 }
 0x122   :  { %v1120_v59 = vmax.f32 %v1056_v55, 0.0  ;;  %1185 = vst.msk [vmem:[%s2240_s3 + $0x1e8] sm:$0xff] %vm18_vm1, %v1121_v57  ;;  %v1059_v63 = vadd.f32 %v1857_v30, %v988_v61  ;;  %v955_v0 = vld [vmem:[#allocation2 + $0xf0] sm:$0xff] }
 0x123   :  { %v987_v1 = vld [vmem:[#allocation2 + $0x1f0] sm:$0xff]  ;;  %1152 = vst.msk [vmem:[%s2240_s3 + $0xe0] sm:$0xff] %vm18_vm1, %v1088_v58  ;;  %v1026_v2 = vadd.f32 %v1857_v30, %v955_v0  ;;  %v1091_v4 = vmax.f32 %v1027_v62, 0.0 }
 0x124   :  { %1184 = vst.msk [vmem:[%s2240_s3 + $0x1e0] sm:$0xff] %vm18_vm1, %v1120_v59  ;;  %v1058_v3 = vadd.f32 %v1857_v30, %v987_v1  ;;  %v1123_v5 = vmax.f32 %v1059_v63, 0.0 }
 0x125   :  { %v1090_v6 = vmax.f32 %v1026_v2, 0.0  ;;  %1155 = vst.msk [vmem:[%s2240_s3 + $0xf8] sm:$0xff] %vm18_vm1, %v1091_v4 }
 0x126   :  { %v1122_v7 = vmax.f32 %v1058_v3, 0.0  ;;  %1187 = vst.msk [vmem:[%s2240_s3 + $0x1f8] sm:$0xff] %vm18_vm1, %v1123_v5 }
 0x127   :  { %1154 = vst.msk [vmem:[%s2240_s3 + $0xf0] sm:$0xff] %vm18_vm1, %v1090_v6 }
 0x128   :  { %1186 = vst.msk [vmem:[%s2240_s3 + $0x1f0] sm:$0xff] %vm18_vm1, %v1122_v7 }

</bundles_post_ra>
